<compile_context>
chip_gen: v7x
topology: tpu7x:2x2x1
jax: 0.10.0
libtpu: 0.0.40
codegen_flags: <defaults>
</compile_context>

<pallas_src>
import jax
import jax.numpy as jnp
from jax.experimental import pallas as pl
from jax.experimental.pallas import tpu as pltpu


def _add_conv1x1_kernel(w_ref, a_ref, b_ref, o_ref):
    # w_ref : (TN, Cin)     bf16 (weight tile, cheap, re-fetched per Cout block)
    # a_ref : (1, Cin, TM)  f32
    # b_ref : (1, Cin, TM)  f32
    # o_ref : (1, TN, TM)   out dtype
    x = (a_ref[0] + b_ref[0]).astype(w_ref.dtype)        # f32 add on VPU -> bf16 for MXU
    o_ref[0] = jax.lax.dot_general(
        w_ref[...], x,
        dimension_numbers=(((1,), (0,)), ((), ())),       # contract Cin; no transposes
        preferred_element_type=jnp.float32,               # f32 accumulation
    ).astype(o_ref.dtype)


def add_conv1x1(x102, x94, weight, *, tm_max=2048, tn_max=288,
                compute_dtype=jnp.bfloat16, out_dtype=jnp.float32):
    """x102, x94: (N, Cin, H, W) f32; weight: (Cout, Cin) or (Cout, Cin, 1, 1)."""
    assert x102.shape == x94.shape
    n, cin, h, w = x102.shape
    weight = weight.reshape(weight.shape[0], cin).astype(compute_dtype)
    cout = weight.shape[0]
    hw = h * w

    # ---- spatial tile: full extent if it fits (full-dim block is always
    # legal), else a lane-aligned tm_max tile with a ragged, masked tail.
    if hw <= tm_max:
        tm = hw
    else:
        assert tm_max % 128 == 0, "tm_max must be a multiple of 128"
        tm = tm_max
    hw_blocks = pl.cdiv(hw, tm)

    # ---- Cout tile: split into blocks (<= tn_max, sublane-aligned) so the
    # grid has >=2 points even for a single-image, single-spatial-tile call
    # (keeps v7x's 2nd TensorCore busy and lets writeback overlap DMA).
    cout_blocks = pl.cdiv(cout, tn_max)
    tn = ((pl.cdiv(cout, cout_blocks) + 7) // 8) * 8
    if tn >= cout:
        tn = cout                                  # full dim always legal
    cout_blocks = pl.cdiv(cout, tn)

    # Free NCHW -> (N, Cin, H*W) reshapes; no HBM padding round trips.
    a = x102.reshape(n, cin, hw)
    b = x94.reshape(n, cin, hw)

    grid = (n, hw_blocks, cout_blocks)             # Cout innermost: A/B not re-DMA'd

    flops = 2 * n * hw * cin * cout
    out_itemsize = jnp.dtype(out_dtype).itemsize
    bytes_accessed = (2 * n * cin * hw * x102.dtype.itemsize   # a + b
                      + weight.size * weight.dtype.itemsize    # weight
                      + n * cout * hw * out_itemsize)          # output

    # Double-buffered working set; only raise the scoped-VMEM limit when we
    # actually get close to v5e's 16 MiB default (v6e/v7x default to 32 MiB).
    vmem_need = (2 * 2 * cin * tm * x102.dtype.itemsize        # a + b, x2 buffers
                 + 2 * tn * tm * out_itemsize                  # out, x2 buffers
                 + 2 * tn * cin * weight.dtype.itemsize)       # weight
    cp_kwargs = dict(dimension_semantics=("parallel", "parallel", "parallel"))
    if vmem_need > 12 * 1024 * 1024:
        cp_kwargs["vmem_limit_bytes"] = int(vmem_need) + (4 << 20)

    w_map = lambda i, j, k: (k, 0)
    a_map = lambda i, j, k: (i, 0, j)              # independent of Cout axis k
    o_map = lambda i, j, k: (i, k, j)

    def build(weight_spec):
        return pl.pallas_call(
            _add_conv1x1_kernel,
            out_shape=jax.ShapeDtypeStruct((n, cout, hw), out_dtype),
            grid=grid,
            in_specs=[
                weight_spec,
                pl.BlockSpec((1, cin, tm), a_map),
                pl.BlockSpec((1, cin, tm), a_map),
            ],
            out_specs=pl.BlockSpec((1, tn, tm), o_map),
            compiler_params=pltpu.CompilerParams(**cp_kwargs),
            cost_estimate=pl.CostEstimate(
                flops=flops, transcendentals=0, bytes_accessed=bytes_accessed),
        )

    try:
        # Single-buffer the (tiny) weight tile; frees a buffer + startup DMA.
        out = build(pl.BlockSpec((tn, cin), w_map,
                                 pipeline_mode=pl.Buffered(1)))(weight, a, b)
    except Exception:
        # Older/other JAX: fall back to the default (double-buffered) spec.
        out = build(pl.BlockSpec((tn, cin), w_map))(weight, a, b)

    # Free reshape back to NCHW; no slicing needed (out_shape already == hw).
    return out.reshape(n, cout, h, w)


if __name__ == "__main__":
    key = jax.random.PRNGKey(0)
    k1, k2, k3 = jax.random.split(key, 3)

    N, Cin, H, W = 1, 96, 14, 14
    Cout = 576

    x102 = jax.random.normal(k1, (N, Cin, H, W), dtype=jnp.float32)
    x94 = jax.random.normal(k2, (N, Cin, H, W), dtype=jnp.float32)
    # Conv2d weight (Cout, Cin, 1, 1), no bias.
    weight = jax.random.normal(k3, (Cout, Cin, 1, 1), dtype=jnp.float32) * 0.05

    out = jax.block_until_ready(add_conv1x1(x102, x94, weight))

    # Reference in plain JAX (f32). bf16 MXU operands => relaxed tolerance.
    ref = jnp.einsum("oc,nchw->nohw", weight.reshape(Cout, Cin), x102 + x94)
    assert out.shape == (N, Cout, H, W), out.shape
    assert jnp.allclose(out, ref, atol=2e-2, rtol=2e-2), float(
        jnp.max(jnp.abs(out - ref)))

    print("KERNEL_OK")
</pallas_src>

<mosaic_0001>
module attributes {stable_mosaic.version = 11 : i64} {
  func.func @_add_conv1x1_kernel(%arg0: i32, %arg1: i32, %arg2: i32, %arg3: memref<288x96xbf16, #tpu.memory_space<vmem>>, %arg4: memref<1x96x196xf32, #tpu.memory_space<vmem>>, %arg5: memref<1x96x196xf32, #tpu.memory_space<vmem>>, %arg6: memref<1x288x196xf32, #tpu.memory_space<vmem>>) attributes {dimension_semantics = [#tpu.dimension_semantics<parallel>, #tpu.dimension_semantics<parallel>, #tpu.dimension_semantics<parallel>], iteration_bounds = array<i64: 1, 1, 2>, scalar_prefetch = 0 : i64, scratch_operands = 0 : i64, tpu.core_type = #tpu.core_type<tc>, window_params = [{pipeline_mode = #tpu.pipeline_mode<synchronous>, transform_indices = @transform_0, window_bounds = array<i64: 288, 96>}, {transform_indices = @transform_1, window_bounds = array<i64: 1, 96, 196>}, {transform_indices = @transform_2, window_bounds = array<i64: 1, 96, 196>}, {transform_indices = @transform_3, window_bounds = array<i64: 1, 288, 196>}]} {
    %c0 = arith.constant 0 : index
    %c0_0 = arith.constant 0 : index
    %c0_1 = arith.constant 0 : index
    %0 = vector.load %arg4[%c0, %c0_0, %c0_1] : memref<1x96x196xf32, #tpu.memory_space<vmem>>, vector<1x96x196xf32>
    %1 = vector.shape_cast %0 : vector<1x96x196xf32> to vector<96x196xf32>
    %c0_2 = arith.constant 0 : index
    %c0_3 = arith.constant 0 : index
    %c0_4 = arith.constant 0 : index
    %2 = vector.load %arg5[%c0_2, %c0_3, %c0_4] : memref<1x96x196xf32, #tpu.memory_space<vmem>>, vector<1x96x196xf32>
    %3 = vector.shape_cast %2 : vector<1x96x196xf32> to vector<96x196xf32>
    %4 = arith.addf %1, %3 : vector<96x196xf32>
    %5 = arith.truncf %4 : vector<96x196xf32> to vector<96x196xbf16>
    %c0_5 = arith.constant 0 : index
    %c0_6 = arith.constant 0 : index
    %6 = vector.load %arg3[%c0_5, %c0_6] : memref<288x96xbf16, #tpu.memory_space<vmem>>, vector<288x96xbf16>
    %cst = arith.constant dense<0.000000e+00> : vector<288x196xf32>
    %7 = tpu.matmul %6, %5, %cst {dimension_numbers = #tpu.dot_dimension_numbers<[1], [0], [0], [1], [0, 0, 1, 1], [], []>} : vector<288x96xbf16>, vector<96x196xbf16>, vector<288x196xf32> -> vector<288x196xf32>
    %c0_7 = arith.constant 0 : index
    %c0_8 = arith.constant 0 : index
    %c0_9 = arith.constant 0 : index
    %8 = vector.load %arg6[%c0_7, %c0_8, %c0_9] : memref<1x288x196xf32, #tpu.memory_space<vmem>>, vector<1x288x196xf32>
    %9 = vector.shape_cast %8 : vector<1x288x196xf32> to vector<288x196xf32>
    %10 = vector.shape_cast %7 : vector<288x196xf32> to vector<1x288x196xf32>
    tpu.vector_store %arg6[%c0_7, %c0_8, %c0_9], %10 {strides = array<i32>} : memref<1x288x196xf32, #tpu.memory_space<vmem>>, vector<1x288x196xf32>,
    return
  }
  func.func @transform_0(%arg0: i32, %arg1: i32, %arg2: i32) -> (i32, i32) {
    %c0_i32 = arith.constant 0 : i32
    %c0_i32_0 = arith.constant 0 : i32
    return %arg2, %c0_i32 : i32, i32
  }
  func.func @transform_1(%arg0: i32, %arg1: i32, %arg2: i32) -> (i32, i32, i32) {
    %c0_i32 = arith.constant 0 : i32
    %c0_i32_0 = arith.constant 0 : i32
    return %arg0, %c0_i32, %arg1 : i32, i32, i32
  }
  func.func @transform_2(%arg0: i32, %arg1: i32, %arg2: i32) -> (i32, i32, i32) {
    %c0_i32 = arith.constant 0 : i32
    %c0_i32_0 = arith.constant 0 : i32
    return %arg0, %c0_i32, %arg1 : i32, i32, i32
  }
  func.func @transform_3(%arg0: i32, %arg1: i32, %arg2: i32) -> (i32, i32, i32) {
    %c0_i32 = arith.constant 0 : i32
    return %arg0, %arg2, %arg1 : i32, i32, i32
  }
}

module attributes {stable_mosaic.version = 11 : i64} {
  func.func @_add_conv1x1_kernel(%arg0: i32, %arg1: i32, %arg2: i32, %arg3: memref<288x96xbf16, #tpu.memory_space<vmem>>, %arg4: memref<1x96x196xf32, #tpu.memory_space<vmem>>, %arg5: memref<1x96x196xf32, #tpu.memory_space<vmem>>, %arg6: memref<1x288x196xf32, #tpu.memory_space<vmem>>) attributes {dimension_semantics = [#tpu.dimension_semantics<parallel>, #tpu.dimension_semantics<parallel>, #tpu.dimension_semantics<parallel>], iteration_bounds = array<i64: 1, 1, 2>, scalar_prefetch = 0 : i64, scratch_operands = 0 : i64, tpu.core_type = #tpu.core_type<tc>, window_params = [{transform_indices = @transform_0, window_bounds = array<i64: 288, 96>}, {transform_indices = @transform_1, window_bounds = array<i64: 1, 96, 196>}, {transform_indices = @transform_2, window_bounds = array<i64: 1, 96, 196>}, {transform_indices = @transform_3, window_bounds = array<i64: 1, 288, 196>}]} {
    %c0 = arith.constant 0 : index
    %c0_0 = arith.constant 0 : index
    %c0_1 = arith.constant 0 : index
    %0 = vector.load %arg4[%c0, %c0_0, %c0_1] : memref<1x96x196xf32, #tpu.memory_space<vmem>>, vector<1x96x196xf32>
    %1 = vector.shape_cast %0 : vector<1x96x196xf32> to vector<96x196xf32>
    %c0_2 = arith.constant 0 : index
    %c0_3 = arith.constant 0 : index
    %c0_4 = arith.constant 0 : index
    %2 = vector.load %arg5[%c0_2, %c0_3, %c0_4] : memref<1x96x196xf32, #tpu.memory_space<vmem>>, vector<1x96x196xf32>
    %3 = vector.shape_cast %2 : vector<1x96x196xf32> to vector<96x196xf32>
    %4 = arith.addf %1, %3 : vector<96x196xf32>
    %5 = arith.truncf %4 : vector<96x196xf32> to vector<96x196xbf16>
    %c0_5 = arith.constant 0 : index
    %c0_6 = arith.constant 0 : index
    %6 = vector.load %arg3[%c0_5, %c0_6] : memref<288x96xbf16, #tpu.memory_space<vmem>>, vector<288x96xbf16>
    %cst = arith.constant dense<0.000000e+00> : vector<288x196xf32>
    %7 = tpu.matmul %6, %5, %cst {dimension_numbers = #tpu.dot_dimension_numbers<[1], [0], [0], [1], [0, 0, 1, 1], [], []>} : vector<288x96xbf16>, vector<96x196xbf16>, vector<288x196xf32> -> vector<288x196xf32>
    %c0_7 = arith.constant 0 : index
    %c0_8 = arith.constant 0 : index
    %c0_9 = arith.constant 0 : index
    %8 = vector.load %arg6[%c0_7, %c0_8, %c0_9] : memref<1x288x196xf32, #tpu.memory_space<vmem>>, vector<1x288x196xf32>
    %9 = vector.shape_cast %8 : vector<1x288x196xf32> to vector<288x196xf32>
    %10 = vector.shape_cast %7 : vector<288x196xf32> to vector<1x288x196xf32>
    tpu.vector_store %arg6[%c0_7, %c0_8, %c0_9], %10 {strides = array<i32>} : memref<1x288x196xf32, #tpu.memory_space<vmem>>, vector<1x288x196xf32>,
    return
  }
  func.func @transform_0(%arg0: i32, %arg1: i32, %arg2: i32) -> (i32, i32) {
    %c0_i32 = arith.constant 0 : i32
    %c0_i32_0 = arith.constant 0 : i32
    return %arg2, %c0_i32 : i32, i32
  }
  func.func @transform_1(%arg0: i32, %arg1: i32, %arg2: i32) -> (i32, i32, i32) {
    %c0_i32 = arith.constant 0 : i32
    %c0_i32_0 = arith.constant 0 : i32
    return %arg0, %c0_i32, %arg1 : i32, i32, i32
  }
  func.func @transform_2(%arg0: i32, %arg1: i32, %arg2: i32) -> (i32, i32, i32) {
    %c0_i32 = arith.constant 0 : i32
    %c0_i32_0 = arith.constant 0 : i32
    return %arg0, %c0_i32, %arg1 : i32, i32, i32
  }
  func.func @transform_3(%arg0: i32, %arg1: i32, %arg2: i32) -> (i32, i32, i32) {
    %c0_i32 = arith.constant 0 : i32
    return %arg0, %arg2, %arg1 : i32, i32, i32
  }
}

</mosaic_0001>

<bundles_post_ra>
// kernel: tpu_custom_call.1
= control target key start
LH: loop header
LB: loop body
LE: loop exit
PB: predicated region body
PF: predicated region fallthrough
CT: control target
= control target key end

     0   :  { %s1136_s12 = smov 0   ;;  %s1138_s13 = smov 0   ;;  %s1496_s0 = inlined_call_operand.vmem [shape: bf16[576,96], index: 0, kind: input, shape index: {}]   ;;  %s1497_s1 = inlined_call_operand.vmem [shape: f32[1,96,196], index: 1, kind: input, shape index: {}]   ;;  %s1498_s2 = inlined_call_operand.vmem [shape: f32[1,96,196], index: 2, kind: input, shape index: {}]   ;;  %s1499_s3 = inlined_call_operand.vmem [shape: f32[1,576,196], index: 3, kind: output, shape index: {}]  }
   0x1   :  { %s1140_s14 = smov 0  }
   0x2 LB: > { %s25_s15 = sadd.s32 1, %s1109_s13  ;;  %p993_p0 = scmp.ge.s32.totalorder %s1113_s14, 1  ;;  %s1113_s14 = sphi %s1140_s14, %s13_s14   ;;  %s1109_s13 = sphi %s1138_s13, %s1502_s13   ;;  %s1105_s12 = sphi %s1136_s12, %s1501_s12  }
   0x3   : > { %p26_p1 = scmp.ge.s32.totalorder %s25_s15, 2  ;;  %p195_p2 = scmp.lt.s32.totalorder %s1113_s14, 3 }
   0x5   : > { %s1504_s15 = smov (%p26_p1, %s25_s15), 0  ;;  %p196_p3 = pnand %p993_p0, %p195_p2 }
   0x6   : > { %v290_v0 = vld [vmem:[%s1497_s1 + $0x8] sm:$0xff] (!%p196_p3)  ;;  %v292_v1 = vld [vmem:[%s1497_s1 + $0x18] sm:$0xff] (!%p196_p3)  ;;  %s246_s22 = smul.u32 (!%p196_p3), 36, %s1105_s12  ;;  %v289_v5 = vld [vmem:[%s1497_s1] sm:$0xff] (!%p196_p3)  ;;  %v1115_v7 = vmov (!%p196_p3), 0   ;;  %vm499_vm0 = vcmask (!%p196_p3), 785408  }
   0x7   : > { %199 = sbr.rel (%p196_p3) target bundleno = 316 (0x13c), region = 32  ;;  %v314_v2 = vld [vmem:[%s1498_s2 + $0x8] sm:$0xff] (!%p196_p3)  ;;  %v316_v3 = vld [vmem:[%s1498_s2 + $0x18] sm:$0xff] (!%p196_p3)  ;;  %v291_v6 = vld [vmem:[%s1497_s1 + $0x10] sm:$0xff] (!%p196_p3)  ;;  %586 = vmatprep.mubr.bf16.mxu0 (!%p196_p3), %v1115_v7  ;;  %676 = vmatprep.mubr.bf16.mxu1 (!%p196_p3), %v1115_v7  ;;  %vm768_vm1 = vcmask (!%p196_p3), 556032  }
   0x8   : > { %v338_v4 = vadd.f32 (!%p196_p3), %v314_v2, %v290_v0  ;;  %v340_v8 = vadd.f32 (!%p196_p3), %v316_v3, %v292_v1  ;;  %v313_v9 = vld [vmem:[%s1498_s2] sm:$0xff] (!%p196_p3)  ;;  %v315_v10 = vld [vmem:[%s1498_s2 + $0x10] sm:$0xff] (!%p196_p3)  ;;  %v294_v11 = vld [vmem:[%s1497_s1 + $0x28] sm:$0xff] (!%p196_p3)  ;;  %p1206_p4 = scmp.lt.s32.totalorder (!%p196_p3), %s246_s22, 71 }
   0x9   : > { %v337_v12 = vadd.f32 (!%p196_p3), %v313_v9, %v289_v5  ;;  %v339_v13 = vadd.f32 (!%p196_p3), %v315_v10, %v291_v6  ;;  %v296_v14 = vld [vmem:[%s1497_s1 + $0x38] sm:$0xff] (!%p196_p3)  ;;  %v318_v15 = vld [vmem:[%s1498_s2 + $0x28] sm:$0xff] (!%p196_p3)  ;;  %v293_v20 = vld [vmem:[%s1497_s1 + $0x20] sm:$0xff] (!%p196_p3) }
   0xa   : > { %v320_v16 = vld [vmem:[%s1498_s2 + $0x38] sm:$0xff] (!%p196_p3)  ;;  %v362_v17 = vpack.c.bf16 (!%p196_p3), %v340_v8, %v338_v4  ;;  %v342_v18 = vadd.f32 (!%p196_p3), %v318_v15, %v294_v11  ;;  %v295_v21 = vld [vmem:[%s1497_s1 + $0x30] sm:$0xff] (!%p196_p3)  ;;  %v317_v22 = vld [vmem:[%s1498_s2 + $0x20] sm:$0xff] (!%p196_p3) }
   0xb   : > { %v344_v19 = vadd.f32 (!%p196_p3), %v320_v16, %v296_v14  ;;  %v361_v23 = vpack.c.bf16 (!%p196_p3), %v339_v13, %v337_v12  ;;  %v319_v24 = vld [vmem:[%s1498_s2 + $0x30] sm:$0xff] (!%p196_p3)  ;;  %v341_v25 = vadd.f32 (!%p196_p3), %v317_v22, %v293_v20  ;;  %v298_v26 = vld [vmem:[%s1497_s1 + $0x48] sm:$0xff] (!%p196_p3)  ;;  %v300_v27 = vld [vmem:[%s1497_s1 + $0x58] sm:$0xff] (!%p196_p3) }
   0xc   : > { %554 = vmatprep.subr.bf16.mxu0 (!%p196_p3), %v362_v17  ;;  %1036 = vmatprep.subr.bf16.mxu1 (!%p196_p3), %v362_v17  ;;  %v343_v29 = vadd.f32 (!%p196_p3), %v319_v24, %v295_v21  ;;  %v322_v30 = vld [vmem:[%s1498_s2 + $0x48] sm:$0xff] (!%p196_p3)  ;;  %v324_v31 = vld [vmem:[%s1498_s2 + $0x58] sm:$0xff] (!%p196_p3)  ;;  %v297_v32 = vld [vmem:[%s1497_s1 + $0x40] sm:$0xff] (!%p196_p3) }
   0xd   : > { %v364_v28 = vpack.c.bf16 (!%p196_p3), %v344_v19, %v342_v18  ;;  %555 = vmatpush1.bf16.msra.mxu0 (!%p196_p3), %v361_v23  ;;  %1042 = vmatpush1.bf16.msra.mxu1 (!%p196_p3), %v361_v23  ;;  %v346_v33 = vadd.f32 (!%p196_p3), %v322_v30, %v298_v26  ;;  %v348_v34 = vadd.f32 (!%p196_p3), %v324_v31, %v300_v27  ;;  %v299_v35 = vld [vmem:[%s1497_s1 + $0x50] sm:$0xff] (!%p196_p3)  ;;  %v321_v36 = vld [vmem:[%s1498_s2 + $0x40] sm:$0xff] (!%p196_p3)  ;;  %v302_v41 = vld [vmem:[%s1497_s1 + $0x68] sm:$0xff] (!%p196_p3) }
   0xe   : > { %v323_v37 = vld [vmem:[%s1498_s2 + $0x50] sm:$0xff]  ;;  %v363_v38 = vpack.c.bf16 %v343_v29, %v341_v25  ;;  %v345_v39 = vadd.f32 %v321_v36, %v297_v32  ;;  %v304_v42 = vld [vmem:[%s1497_s1 + $0x78] sm:$0xff]  ;;  %v326_v43 = vld [vmem:[%s1498_s2 + $0x68] sm:$0xff]  ;;  %s1506_s22 = smov (!%p1206_p4, %s246_s22), 71 }
   0xf   : > { %556 = vmatprep.subr.bf16.mxu0 %v364_v28  ;;  %1037 = vmatprep.subr.bf16.mxu1 %v364_v28  ;;  %v347_v40 = vadd.f32 %v323_v37, %v299_v35  ;;  %v366_v44 = vpack.c.bf16 %v348_v34, %v346_v33  ;;  %v328_v45 = vld [vmem:[%s1498_s2 + $0x78] sm:$0xff]  ;;  %v350_v46 = vadd.f32 %v326_v43, %v302_v41  ;;  %v301_v47 = vld [vmem:[%s1497_s1 + $0x60] sm:$0xff]  ;;  %v303_v48 = vld [vmem:[%s1497_s1 + $0x70] sm:$0xff]  ;;  %s994_s30 = sshll.u32 %s1506_s22, 2  ;;  %s1035_s29 = sshll.u32 %s1506_s22, 4 }
  0x10   : > { %v352_v49 = vadd.f32 %v328_v45, %v304_v42  ;;  %v325_v50 = vld [vmem:[%s1498_s2 + $0x60] sm:$0xff]  ;;  %v327_v51 = vld [vmem:[%s1498_s2 + $0x70] sm:$0xff]  ;;  %v306_v52 = vld [vmem:[%s1497_s1 + $0x88] sm:$0xff]  ;;  %s1316_s26 = scalar_lea.vmem %s1496_s0, %s994_s30  ;;  %s1377_s5 = scalar_lea.vmem %s1499_s3, %s1035_s29 }
  0x11   : > { %557 = vmatpush1.bf16.msra.mxu0 %v363_v38  ;;  %1043 = vmatpush1.bf16.msra.mxu1 %v363_v38  ;;  %v365_v53 = vpack.c.bf16 %v347_v40, %v345_v39  ;;  %v349_v54 = vadd.f32 %v325_v50, %v301_v47  ;;  %v351_v55 = vadd.f32 %v327_v51, %v303_v48  ;;  %v308_v56 = vld [vmem:[%s1497_s1 + $0x98] sm:$0xff]  ;;  %v330_v57 = vld [vmem:[%s1498_s2 + $0x88] sm:$0xff]  ;;  %v305_v62 = vld [vmem:[%s1497_s1 + $0x80] sm:$0xff] }
  0x12   : > { %v332_v58 = vld [vmem:[%s1498_s2 + $0x98] sm:$0xff]  ;;  %558 = vmatprep.subr.bf16.mxu0 %v366_v44  ;;  %1038 = vmatprep.subr.bf16.mxu1 %v366_v44  ;;  %v368_v59 = vpack.c.bf16 %v352_v49, %v350_v46  ;;  %v354_v60 = vadd.f32 %v330_v57, %v306_v52  ;;  %v307_v63 = vld [vmem:[%s1497_s1 + $0x90] sm:$0xff]  ;;  %v329_v0 = vld [vmem:[%s1498_s2 + $0x80] sm:$0xff] }
  0x13   : > { %v356_v61 = vadd.f32 %v332_v58, %v308_v56  ;;  %v331_v1 = vld [vmem:[%s1498_s2 + $0x90] sm:$0xff]  ;;  %v310_v2 = vld [vmem:[%s1497_s1 + $0xa8] sm:$0xff]  ;;  %v312_v3 = vld [vmem:[%s1497_s1 + $0xb8] sm:$0xff]  ;;  %v367_v6 = vpack.c.bf16 %v351_v55, %v349_v54  ;;  %v353_v8 = vadd.f32 %v329_v0, %v305_v62 }
  0x14   : > { %v334_v4 = vld [vmem:[%s1498_s2 + $0xa8] sm:$0xff]  ;;  %v336_v5 = vld [vmem:[%s1498_s2 + $0xb8] sm:$0xff]  ;;  %v355_v9 = vadd.f32 %v331_v1, %v307_v63  ;;  %v309_v10 = vld [vmem:[%s1497_s1 + $0xa0] sm:$0xff] }
  0x15   : > { %559 = vmatpush1.bf16.msra.mxu0 %v365_v53  ;;  %1044 = vmatpush1.bf16.msra.mxu1 %v365_v53  ;;  %v311_v11 = vld [vmem:[%s1497_s1 + $0xb0] sm:$0xff]  ;;  %v333_v12 = vld [vmem:[%s1498_s2 + $0xa0] sm:$0xff]  ;;  %v370_v13 = vpack.c.bf16 %v356_v61, %v354_v60  ;;  %v358_v14 = vadd.f32 %v334_v4, %v310_v2  ;;  %v360_v15 = vadd.f32 %v336_v5, %v312_v3  ;;  %v1074_v23 = vld [vmem:[%s1316_s26 + $0x48] sm:$0xff]  }
  0x16   : > { %560 = vmatprep.subr.bf16.mxu0 %v368_v59  ;;  %1039 = vmatprep.subr.bf16.mxu1 %v368_v59  ;;  %v335_v16 = vld [vmem:[%s1498_s2 + $0xb0] sm:$0xff]  ;;  %v369_v17 = vpack.c.bf16 %v355_v9, %v353_v8  ;;  %v357_v18 = vadd.f32 %v333_v12, %v309_v10  ;;  %v1073_v22 = vld [vmem:[%s1316_s26] sm:$0xff]   ;;  %v1075_v24 = vld [vmem:[%s1316_s26 + $0x8] sm:$0xff]  }
  0x17   : > { %v359_v19 = vadd.f32 %v335_v16, %v311_v11  ;;  %v372_v20 = vpack.c.bf16 %v360_v15, %v358_v14  ;;  %v1076_v25 = vld [vmem:[%s1316_s26 + $0x50] sm:$0xff]   ;;  %v1078_v27 = vld [vmem:[%s1316_s26 + $0x58] sm:$0xff]   ;;  %v1080_v29 = vld [vmem:[%s1316_s26 + $0x60] sm:$0xff]  }
  0x18   : > { %v1077_v26 = vld [vmem:[%s1316_s26 + $0x10] sm:$0xff]   ;;  %v1079_v28 = vld [vmem:[%s1316_s26 + $0x18] sm:$0xff]   ;;  %v1081_v30 = vld [vmem:[%s1316_s26 + $0x20] sm:$0xff]  }
  0x19   : > { %561 = vmatpush1.bf16.msra.mxu0 %v367_v6  ;;  %1045 = vmatpush1.bf16.msra.mxu1 %v367_v6  ;;  %v371_v21 = vpack.c.bf16 %v359_v19, %v357_v18  ;;  %v1082_v31 = vld [vmem:[%s1316_s26 + $0x68] sm:$0xff]   ;;  %v1084_v33 = vld [vmem:[%s1316_s26 + $0x70] sm:$0xff]   ;;  %v1086_v35 = vld [vmem:[%s1316_s26 + $0x78] sm:$0xff]  }
  0x1a   : > { %562 = vmatprep.subr.bf16.mxu0 %v370_v13  ;;  %1040 = vmatprep.subr.bf16.mxu1 %v370_v13  ;;  %v1083_v32 = vld [vmem:[%s1316_s26 + $0x28] sm:$0xff]   ;;  %v1085_v34 = vld [vmem:[%s1316_s26 + $0x30] sm:$0xff]   ;;  %v1087_v36 = vld [vmem:[%s1316_s26 + $0x38] sm:$0xff]  }
  0x1b   : > { %v1088_v37 = vld [vmem:[%s1316_s26 + $0x80] sm:$0xff]   ;;  %v1090_v39 = vld [vmem:[%s1316_s26 + $0x88] sm:$0xff]  }
  0x1c   : > { %v1089_v38 = vld [vmem:[%s1316_s26 + $0x40] sm:$0xff]  }
  0x1d   : > { %563 = vmatpush1.bf16.msra.mxu0 %v369_v17  ;;  %1046 = vmatpush1.bf16.msra.mxu1 %v369_v17 }
  0x1e   : > { %564 = vmatprep.subr.bf16.mxu0 %v372_v20  ;;  %1041 = vmatprep.subr.bf16.mxu1 %v372_v20 }
  0x21   : > { %565 = vmatpush1.bf16.msra.mxu0 %v371_v21  ;;  %1047 = vmatpush1.bf16.msra.mxu1 %v371_v21 }
  0x24   : > { %1015 = vmatmul.mubr.msk.bf16.vlgmr.msra.gmra.mrb[0].mxu0 %vm499_vm0, %v1073_v22  ;;  %1024 = vmatmul.mubr.msk.bf16.vlgmr.msra.gmra.mrb[0].mxu1 %vm499_vm0, %v1074_v23 }
  0x25   : > { %596 = vmatprep.mubr.bf16.mxu0 %v1115_v7  ;;  %686 = vmatprep.mubr.bf16.mxu1 %v1115_v7 }
  0x2c   : > { %1016 = vmatmul.mubr.msk.bf16.gmra.mrb[4].mxu0 %vm499_vm0, %v1075_v24  ;;  %1025 = vmatmul.mubr.msk.bf16.gmra.mrb[4].mxu1 %vm499_vm0, %v1076_v25 }
  0x2d   : > { %606 = vmatprep.mubr.bf16.mxu0 %v1115_v7  ;;  %696 = vmatprep.mubr.bf16.mxu1 %v1115_v7 }
  0x34   : > { %1017 = vmatmul.mubr.msk.bf16.gmra.mrb[8].mxu0 %vm499_vm0, %v1077_v26  ;;  %1026 = vmatmul.mubr.msk.bf16.gmra.mrb[8].mxu1 %vm499_vm0, %v1078_v27 }
  0x35   : > { %616 = vmatprep.mubr.bf16.mxu0 %v1115_v7  ;;  %706 = vmatprep.mubr.bf16.mxu1 %v1115_v7 }
  0x3c   : > { %1018 = vmatmul.mubr.msk.bf16.gmra.mrb[12].mxu0 %vm499_vm0, %v1079_v28  ;;  %1027 = vmatmul.mubr.msk.bf16.gmra.mrb[12].mxu1 %vm499_vm0, %v1080_v29 }
  0x3d   : > { %626 = vmatprep.mubr.bf16.mxu0 %v1115_v7  ;;  %716 = vmatprep.mubr.bf16.mxu1 %v1115_v7 }
  0x44   : > { %1019 = vmatmul.mubr.msk.bf16.gmra.mrb[16].mxu0 %vm499_vm0, %v1081_v30  ;;  %1028 = vmatmul.mubr.msk.bf16.gmra.mrb[16].mxu1 %vm499_vm0, %v1082_v31 }
  0x45   : > { %636 = vmatprep.mubr.bf16.mxu0 %v1115_v7  ;;  %726 = vmatprep.mubr.bf16.mxu1 %v1115_v7 }
  0x4c   : > { %1020 = vmatmul.mubr.msk.bf16.gmra.mrb[20].mxu0 %vm499_vm0, %v1083_v32  ;;  %1029 = vmatmul.mubr.msk.bf16.gmra.mrb[20].mxu1 %vm499_vm0, %v1084_v33 }
  0x4d   : > { %646 = vmatprep.mubr.bf16.mxu0 %v1115_v7  ;;  %736 = vmatprep.mubr.bf16.mxu1 %v1115_v7 }
  0x54   : > { %1021 = vmatmul.mubr.msk.bf16.gmra.mrb[24].mxu0 %vm499_vm0, %v1085_v34  ;;  %1030 = vmatmul.mubr.msk.bf16.gmra.mrb[24].mxu1 %vm499_vm0, %v1086_v35 }
  0x55   : > { %656 = vmatprep.mubr.bf16.mxu0 %v1115_v7  ;;  %746 = vmatprep.mubr.bf16.mxu1 %v1115_v7 }
  0x5c   : > { %1022 = vmatmul.mubr.msk.bf16.gmra.mrb[28].mxu0 %vm499_vm0, %v1087_v36  ;;  %1031 = vmatmul.mubr.msk.bf16.gmra.mrb[28].mxu1 %vm499_vm0, %v1088_v37 }
  0x5d   : > { %666 = vmatprep.mubr.bf16.mxu0 %v1115_v7  ;;  %756 = vmatprep.mubr.bf16.mxu1 %v1115_v7 }
  0x64   : > { %1023 = vmatmul.mubr.msk.bf16.gmra.mrb[32].mxu0 %vm499_vm0, %v1089_v38  ;;  %1032 = vmatmul.mubr.msk.bf16.gmra.mrb[32].mxu1 %vm499_vm0, %v1090_v39 }
  0xf7   : > { %v588_v7 = vpop.f32.mrb[0].mxu0  ;;  %v678_v40 = vpop.f32.mrb[0].mxu1 }
  0xf8   : > { %767 = vst [vmem:[%s1377_s5] sm:$0xff] %v588_v7  ;;  %804 = vst [vmem:[%s1377_s5 + $0x120] sm:$0xff] %v678_v40  ;;  %v590_v41 = vpop.f32.mrb[1].mxu0  ;;  %v680_v42 = vpop.f32.mrb[1].mxu1 }
  0xf9   : > { %769 = vst.msk [vmem:[%s1377_s5 + $0x8] sm:$0xff] %vm768_vm1, %v590_v41  ;;  %805 = vst.msk [vmem:[%s1377_s5 + $0x128] sm:$0xff] %vm768_vm1, %v680_v42  ;;  %v592_v43 = vpop.f32.mrb[2].mxu0  ;;  %v682_v44 = vpop.f32.mrb[2].mxu1 }
  0xfa   : > { %770 = vst [vmem:[%s1377_s5 + $0x10] sm:$0xff] %v592_v43  ;;  %806 = vst [vmem:[%s1377_s5 + $0x130] sm:$0xff] %v682_v44  ;;  %v594_v45 = vpop.f32.mrb[3].mxu0  ;;  %v684_v46 = vpop.f32.mrb[3].mxu1 }
  0xfb   : > { %771 = vst.msk [vmem:[%s1377_s5 + $0x18] sm:$0xff] %vm768_vm1, %v594_v45  ;;  %807 = vst.msk [vmem:[%s1377_s5 + $0x138] sm:$0xff] %vm768_vm1, %v684_v46 }
  0xff   : > { %v598_v47 = vpop.f32.mrb[4].mxu0  ;;  %v688_v48 = vpop.f32.mrb[4].mxu1 }
 0x100   : > { %772 = vst [vmem:[%s1377_s5 + $0x20] sm:$0xff] %v598_v47  ;;  %808 = vst [vmem:[%s1377_s5 + $0x140] sm:$0xff] %v688_v48  ;;  %v600_v49 = vpop.f32.mrb[5].mxu0  ;;  %v690_v50 = vpop.f32.mrb[5].mxu1 }
 0x101   : > { %773 = vst.msk [vmem:[%s1377_s5 + $0x28] sm:$0xff] %vm768_vm1, %v600_v49  ;;  %809 = vst.msk [vmem:[%s1377_s5 + $0x148] sm:$0xff] %vm768_vm1, %v690_v50  ;;  %v602_v51 = vpop.f32.mrb[6].mxu0  ;;  %v692_v52 = vpop.f32.mrb[6].mxu1 }
 0x102   : > { %774 = vst [vmem:[%s1377_s5 + $0x30] sm:$0xff] %v602_v51  ;;  %810 = vst [vmem:[%s1377_s5 + $0x150] sm:$0xff] %v692_v52  ;;  %v604_v53 = vpop.f32.mrb[7].mxu0  ;;  %v694_v54 = vpop.f32.mrb[7].mxu1 }
 0x103   : > { %775 = vst.msk [vmem:[%s1377_s5 + $0x38] sm:$0xff] %vm768_vm1, %v604_v53  ;;  %811 = vst.msk [vmem:[%s1377_s5 + $0x158] sm:$0xff] %vm768_vm1, %v694_v54 }
 0x107   : > { %v608_v55 = vpop.f32.mrb[8].mxu0  ;;  %v698_v56 = vpop.f32.mrb[8].mxu1 }
 0x108   : > { %776 = vst [vmem:[%s1377_s5 + $0x40] sm:$0xff] %v608_v55  ;;  %812 = vst [vmem:[%s1377_s5 + $0x160] sm:$0xff] %v698_v56  ;;  %v610_v57 = vpop.f32.mrb[9].mxu0  ;;  %v700_v58 = vpop.f32.mrb[9].mxu1 }
 0x109   : > { %777 = vst.msk [vmem:[%s1377_s5 + $0x48] sm:$0xff] %vm768_vm1, %v610_v57  ;;  %813 = vst.msk [vmem:[%s1377_s5 + $0x168] sm:$0xff] %vm768_vm1, %v700_v58  ;;  %v612_v59 = vpop.f32.mrb[10].mxu0  ;;  %v702_v60 = vpop.f32.mrb[10].mxu1 }
 0x10a   : > { %778 = vst [vmem:[%s1377_s5 + $0x50] sm:$0xff] %v612_v59  ;;  %814 = vst [vmem:[%s1377_s5 + $0x170] sm:$0xff] %v702_v60  ;;  %v614_v61 = vpop.f32.mrb[11].mxu0  ;;  %v704_v62 = vpop.f32.mrb[11].mxu1 }
 0x10b   : > { %779 = vst.msk [vmem:[%s1377_s5 + $0x58] sm:$0xff] %vm768_vm1, %v614_v61  ;;  %815 = vst.msk [vmem:[%s1377_s5 + $0x178] sm:$0xff] %vm768_vm1, %v704_v62 }
 0x10f   : > { %v618_v63 = vpop.f32.mrb[12].mxu0  ;;  %v708_v0 = vpop.f32.mrb[12].mxu1 }
 0x110   : > { %780 = vst [vmem:[%s1377_s5 + $0x60] sm:$0xff] %v618_v63  ;;  %816 = vst [vmem:[%s1377_s5 + $0x180] sm:$0xff] %v708_v0  ;;  %v620_v1 = vpop.f32.mrb[13].mxu0  ;;  %v710_v2 = vpop.f32.mrb[13].mxu1 }
 0x111   : > { %781 = vst.msk [vmem:[%s1377_s5 + $0x68] sm:$0xff] %vm768_vm1, %v620_v1  ;;  %817 = vst.msk [vmem:[%s1377_s5 + $0x188] sm:$0xff] %vm768_vm1, %v710_v2  ;;  %v622_v3 = vpop.f32.mrb[14].mxu0  ;;  %v712_v4 = vpop.f32.mrb[14].mxu1 }
 0x112   : > { %782 = vst [vmem:[%s1377_s5 + $0x70] sm:$0xff] %v622_v3  ;;  %818 = vst [vmem:[%s1377_s5 + $0x190] sm:$0xff] %v712_v4  ;;  %v624_v5 = vpop.f32.mrb[15].mxu0  ;;  %v714_v6 = vpop.f32.mrb[15].mxu1 }
 0x113   : > { %783 = vst.msk [vmem:[%s1377_s5 + $0x78] sm:$0xff] %vm768_vm1, %v624_v5  ;;  %819 = vst.msk [vmem:[%s1377_s5 + $0x198] sm:$0xff] %vm768_vm1, %v714_v6 }
 0x117   : > { %v628_v8 = vpop.f32.mrb[16].mxu0  ;;  %v718_v9 = vpop.f32.mrb[16].mxu1 }
 0x118   : > { %784 = vst [vmem:[%s1377_s5 + $0x80] sm:$0xff] %v628_v8  ;;  %820 = vst [vmem:[%s1377_s5 + $0x1a0] sm:$0xff] %v718_v9  ;;  %v630_v10 = vpop.f32.mrb[17].mxu0  ;;  %v720_v11 = vpop.f32.mrb[17].mxu1 }
 0x119   : > { %785 = vst.msk [vmem:[%s1377_s5 + $0x88] sm:$0xff] %vm768_vm1, %v630_v10  ;;  %821 = vst.msk [vmem:[%s1377_s5 + $0x1a8] sm:$0xff] %vm768_vm1, %v720_v11  ;;  %v632_v12 = vpop.f32.mrb[18].mxu0  ;;  %v722_v13 = vpop.f32.mrb[18].mxu1 }
 0x11a   : > { %786 = vst [vmem:[%s1377_s5 + $0x90] sm:$0xff] %v632_v12  ;;  %822 = vst [vmem:[%s1377_s5 + $0x1b0] sm:$0xff] %v722_v13  ;;  %v634_v14 = vpop.f32.mrb[19].mxu0  ;;  %v724_v15 = vpop.f32.mrb[19].mxu1 }
 0x11b   : > { %787 = vst.msk [vmem:[%s1377_s5 + $0x98] sm:$0xff] %vm768_vm1, %v634_v14  ;;  %823 = vst.msk [vmem:[%s1377_s5 + $0x1b8] sm:$0xff] %vm768_vm1, %v724_v15 }
 0x11f   : > { %v638_v16 = vpop.f32.mrb[20].mxu0  ;;  %v728_v17 = vpop.f32.mrb[20].mxu1 }
 0x120   : > { %788 = vst [vmem:[%s1377_s5 + $0xa0] sm:$0xff] %v638_v16  ;;  %824 = vst [vmem:[%s1377_s5 + $0x1c0] sm:$0xff] %v728_v17  ;;  %v640_v18 = vpop.f32.mrb[21].mxu0  ;;  %v730_v19 = vpop.f32.mrb[21].mxu1 }
 0x121   : > { %789 = vst.msk [vmem:[%s1377_s5 + $0xa8] sm:$0xff] %vm768_vm1, %v640_v18  ;;  %825 = vst.msk [vmem:[%s1377_s5 + $0x1c8] sm:$0xff] %vm768_vm1, %v730_v19  ;;  %v642_v20 = vpop.f32.mrb[22].mxu0  ;;  %v732_v21 = vpop.f32.mrb[22].mxu1 }
 0x122   : > { %790 = vst [vmem:[%s1377_s5 + $0xb0] sm:$0xff] %v642_v20  ;;  %826 = vst [vmem:[%s1377_s5 + $0x1d0] sm:$0xff] %v732_v21  ;;  %v644_v22 = vpop.f32.mrb[23].mxu0  ;;  %v734_v23 = vpop.f32.mrb[23].mxu1 }
 0x123   : > { %791 = vst.msk [vmem:[%s1377_s5 + $0xb8] sm:$0xff] %vm768_vm1, %v644_v22  ;;  %827 = vst.msk [vmem:[%s1377_s5 + $0x1d8] sm:$0xff] %vm768_vm1, %v734_v23 }
 0x127   : > { %v648_v24 = vpop.f32.mrb[24].mxu0  ;;  %v738_v25 = vpop.f32.mrb[24].mxu1 }
 0x128   : > { %792 = vst [vmem:[%s1377_s5 + $0xc0] sm:$0xff] %v648_v24  ;;  %828 = vst [vmem:[%s1377_s5 + $0x1e0] sm:$0xff] %v738_v25  ;;  %v650_v26 = vpop.f32.mrb[25].mxu0  ;;  %v740_v27 = vpop.f32.mrb[25].mxu1 }
 0x129   : > { %793 = vst.msk [vmem:[%s1377_s5 + $0xc8] sm:$0xff] %vm768_vm1, %v650_v26  ;;  %829 = vst.msk [vmem:[%s1377_s5 + $0x1e8] sm:$0xff] %vm768_vm1, %v740_v27  ;;  %v652_v28 = vpop.f32.mrb[26].mxu0  ;;  %v742_v29 = vpop.f32.mrb[26].mxu1 }
 0x12a   : > { %794 = vst [vmem:[%s1377_s5 + $0xd0] sm:$0xff] %v652_v28  ;;  %830 = vst [vmem:[%s1377_s5 + $0x1f0] sm:$0xff] %v742_v29  ;;  %v654_v30 = vpop.f32.mrb[27].mxu0  ;;  %v744_v31 = vpop.f32.mrb[27].mxu1 }
 0x12b   : > { %795 = vst.msk [vmem:[%s1377_s5 + $0xd8] sm:$0xff] %vm768_vm1, %v654_v30  ;;  %831 = vst.msk [vmem:[%s1377_s5 + $0x1f8] sm:$0xff] %vm768_vm1, %v744_v31 }
 0x12f   : > { %v658_v32 = vpop.f32.mrb[28].mxu0  ;;  %v748_v33 = vpop.f32.mrb[28].mxu1 }
 0x130   : > { %796 = vst [vmem:[%s1377_s5 + $0xe0] sm:$0xff] %v658_v32  ;;  %832 = vst [vmem:[%s1377_s5 + $0x200] sm:$0xff] %v748_v33  ;;  %v660_v34 = vpop.f32.mrb[29].mxu0  ;;  %v750_v35 = vpop.f32.mrb[29].mxu1 }
 0x131   : > { %797 = vst.msk [vmem:[%s1377_s5 + $0xe8] sm:$0xff] %vm768_vm1, %v660_v34  ;;  %833 = vst.msk [vmem:[%s1377_s5 + $0x208] sm:$0xff] %vm768_vm1, %v750_v35  ;;  %v662_v36 = vpop.f32.mrb[30].mxu0  ;;  %v752_v37 = vpop.f32.mrb[30].mxu1 }
 0x132   : > { %798 = vst [vmem:[%s1377_s5 + $0xf0] sm:$0xff] %v662_v36  ;;  %834 = vst [vmem:[%s1377_s5 + $0x210] sm:$0xff] %v752_v37  ;;  %v664_v38 = vpop.f32.mrb[31].mxu0  ;;  %v754_v39 = vpop.f32.mrb[31].mxu1 }
 0x133   : > { %799 = vst.msk [vmem:[%s1377_s5 + $0xf8] sm:$0xff] %vm768_vm1, %v664_v38  ;;  %835 = vst.msk [vmem:[%s1377_s5 + $0x218] sm:$0xff] %vm768_vm1, %v754_v39 }
 0x137   : > { %v668_v7 = vpop.f32.mrb[32].mxu0  ;;  %v758_v40 = vpop.f32.mrb[32].mxu1 }
 0x138   : > { %800 = vst [vmem:[%s1377_s5 + $0x100] sm:$0xff] %v668_v7  ;;  %836 = vst [vmem:[%s1377_s5 + $0x220] sm:$0xff] %v758_v40  ;;  %v670_v41 = vpop.f32.mrb[33].mxu0  ;;  %v760_v42 = vpop.f32.mrb[33].mxu1 }
 0x139   : > { %801 = vst.msk [vmem:[%s1377_s5 + $0x108] sm:$0xff] %vm768_vm1, %v670_v41  ;;  %837 = vst.msk [vmem:[%s1377_s5 + $0x228] sm:$0xff] %vm768_vm1, %v760_v42  ;;  %v672_v43 = vpop.f32.mrb[34].mxu0  ;;  %v762_v44 = vpop.f32.mrb[34].mxu1 }
 0x13a   : > { %802 = vst [vmem:[%s1377_s5 + $0x110] sm:$0xff] %v672_v43  ;;  %838 = vst [vmem:[%s1377_s5 + $0x230] sm:$0xff] %v762_v44  ;;  %v674_v45 = vpop.f32.mrb[35].mxu0  ;;  %v764_v46 = vpop.f32.mrb[35].mxu1 }
 0x13b   : > { %803 = vst.msk [vmem:[%s1377_s5 + $0x118] sm:$0xff] %vm768_vm1, %v674_v45  ;;  %839 = vst.msk [vmem:[%s1377_s5 + $0x238] sm:$0xff] %vm768_vm1, %v764_v46 }
 0x13c PF: > { %s13_s14 = sadd.s32 1, %s1113_s14   ;;  %s1501_s12 = smov %s1109_s13 }
 0x13d   : > { %p10_p5 = scmp.ge.s32.totalorder %s13_s14, 4   ;;  %s1502_s13 = smov %s1504_s15 }
 0x13f   :  { %12 = sbr.rel (!%p10_p5) target bundleno = 2 (0x2), region = 68 }

// kernel: tpu_custom_call.1
= control target key start
LH: loop header
LB: loop body
LE: loop exit
PB: predicated region body
PF: predicated region fallthrough
CT: control target
= control target key end

     0   :  { %s1134_s12 = smov 0   ;;  %s1136_s13 = smov 0   ;;  %s1494_s0 = inlined_call_operand.vmem [shape: bf16[576,96], index: 0, kind: input, shape index: {}]   ;;  %s1495_s1 = inlined_call_operand.vmem [shape: f32[1,96,196], index: 1, kind: input, shape index: {}]   ;;  %s1496_s2 = inlined_call_operand.vmem [shape: f32[1,96,196], index: 2, kind: input, shape index: {}]   ;;  %s1497_s3 = inlined_call_operand.vmem [shape: f32[1,576,196], index: 3, kind: output, shape index: {}]  }
   0x1   :  { %s1138_s14 = smov 0  }
   0x2 LB: > { %s25_s15 = sadd.s32 1, %s1107_s13  ;;  %p991_p0 = scmp.ge.s32.totalorder %s1111_s14, 1  ;;  %s1111_s14 = sphi %s1138_s14, %s13_s14   ;;  %s1107_s13 = sphi %s1136_s13, %s1500_s13   ;;  %s1103_s12 = sphi %s1134_s12, %s1499_s12  }
   0x3   : > { %p26_p1 = scmp.ge.s32.totalorder %s25_s15, 2  ;;  %p195_p2 = scmp.lt.s32.totalorder %s1111_s14, 3 }
   0x5   : > { %s1502_s15 = smov (%p26_p1, %s25_s15), 0  ;;  %p196_p3 = pnand %p991_p0, %p195_p2 }
   0x6   : > { %v290_v0 = vld [vmem:[%s1495_s1 + $0x8] sm:$0xff] (!%p196_p3)  ;;  %v292_v1 = vld [vmem:[%s1495_s1 + $0x18] sm:$0xff] (!%p196_p3)  ;;  %s246_s22 = smul.u32 (!%p196_p3), 36, %s1103_s12  ;;  %v289_v5 = vld [vmem:[%s1495_s1] sm:$0xff] (!%p196_p3)  ;;  %v1113_v7 = vmov (!%p196_p3), 0   ;;  %vm499_vm0 = vcmask (!%p196_p3), 785408  }
   0x7   : > { %199 = sbr.rel (%p196_p3) target bundleno = 316 (0x13c), region = 32  ;;  %v314_v2 = vld [vmem:[%s1496_s2 + $0x8] sm:$0xff] (!%p196_p3)  ;;  %v316_v3 = vld [vmem:[%s1496_s2 + $0x18] sm:$0xff] (!%p196_p3)  ;;  %v291_v6 = vld [vmem:[%s1495_s1 + $0x10] sm:$0xff] (!%p196_p3)  ;;  %586 = vmatprep.mubr.bf16.mxu0 (!%p196_p3), %v1113_v7  ;;  %676 = vmatprep.mubr.bf16.mxu1 (!%p196_p3), %v1113_v7  ;;  %vm768_vm1 = vcmask (!%p196_p3), 556032  }
   0x8   : > { %v338_v4 = vadd.f32 (!%p196_p3), %v314_v2, %v290_v0  ;;  %v340_v8 = vadd.f32 (!%p196_p3), %v316_v3, %v292_v1  ;;  %v313_v9 = vld [vmem:[%s1496_s2] sm:$0xff] (!%p196_p3)  ;;  %v315_v10 = vld [vmem:[%s1496_s2 + $0x10] sm:$0xff] (!%p196_p3)  ;;  %v294_v11 = vld [vmem:[%s1495_s1 + $0x28] sm:$0xff] (!%p196_p3)  ;;  %p1204_p4 = scmp.lt.s32.totalorder (!%p196_p3), %s246_s22, 71 }
   0x9   : > { %v337_v12 = vadd.f32 (!%p196_p3), %v313_v9, %v289_v5  ;;  %v339_v13 = vadd.f32 (!%p196_p3), %v315_v10, %v291_v6  ;;  %v296_v14 = vld [vmem:[%s1495_s1 + $0x38] sm:$0xff] (!%p196_p3)  ;;  %v318_v15 = vld [vmem:[%s1496_s2 + $0x28] sm:$0xff] (!%p196_p3)  ;;  %v293_v20 = vld [vmem:[%s1495_s1 + $0x20] sm:$0xff] (!%p196_p3) }
   0xa   : > { %v320_v16 = vld [vmem:[%s1496_s2 + $0x38] sm:$0xff] (!%p196_p3)  ;;  %v362_v17 = vpack.c.bf16 (!%p196_p3), %v340_v8, %v338_v4  ;;  %v342_v18 = vadd.f32 (!%p196_p3), %v318_v15, %v294_v11  ;;  %v295_v21 = vld [vmem:[%s1495_s1 + $0x30] sm:$0xff] (!%p196_p3)  ;;  %v317_v22 = vld [vmem:[%s1496_s2 + $0x20] sm:$0xff] (!%p196_p3) }
   0xb   : > { %v344_v19 = vadd.f32 (!%p196_p3), %v320_v16, %v296_v14  ;;  %v361_v23 = vpack.c.bf16 (!%p196_p3), %v339_v13, %v337_v12  ;;  %v319_v24 = vld [vmem:[%s1496_s2 + $0x30] sm:$0xff] (!%p196_p3)  ;;  %v341_v25 = vadd.f32 (!%p196_p3), %v317_v22, %v293_v20  ;;  %v298_v26 = vld [vmem:[%s1495_s1 + $0x48] sm:$0xff] (!%p196_p3)  ;;  %v300_v27 = vld [vmem:[%s1495_s1 + $0x58] sm:$0xff] (!%p196_p3) }
   0xc   : > { %554 = vmatprep.subr.bf16.mxu0 (!%p196_p3), %v362_v17  ;;  %1034 = vmatprep.subr.bf16.mxu1 (!%p196_p3), %v362_v17  ;;  %v343_v29 = vadd.f32 (!%p196_p3), %v319_v24, %v295_v21  ;;  %v322_v30 = vld [vmem:[%s1496_s2 + $0x48] sm:$0xff] (!%p196_p3)  ;;  %v324_v31 = vld [vmem:[%s1496_s2 + $0x58] sm:$0xff] (!%p196_p3)  ;;  %v297_v32 = vld [vmem:[%s1495_s1 + $0x40] sm:$0xff] (!%p196_p3) }
   0xd   : > { %v364_v28 = vpack.c.bf16 (!%p196_p3), %v344_v19, %v342_v18  ;;  %555 = vmatpush1.bf16.msra.mxu0 (!%p196_p3), %v361_v23  ;;  %1040 = vmatpush1.bf16.msra.mxu1 (!%p196_p3), %v361_v23  ;;  %v346_v33 = vadd.f32 (!%p196_p3), %v322_v30, %v298_v26  ;;  %v348_v34 = vadd.f32 (!%p196_p3), %v324_v31, %v300_v27  ;;  %v299_v35 = vld [vmem:[%s1495_s1 + $0x50] sm:$0xff] (!%p196_p3)  ;;  %v321_v36 = vld [vmem:[%s1496_s2 + $0x40] sm:$0xff] (!%p196_p3)  ;;  %v302_v41 = vld [vmem:[%s1495_s1 + $0x68] sm:$0xff] (!%p196_p3) }
   0xe   : > { %v323_v37 = vld [vmem:[%s1496_s2 + $0x50] sm:$0xff]  ;;  %v363_v38 = vpack.c.bf16 %v343_v29, %v341_v25  ;;  %v345_v39 = vadd.f32 %v321_v36, %v297_v32  ;;  %v304_v42 = vld [vmem:[%s1495_s1 + $0x78] sm:$0xff]  ;;  %v326_v43 = vld [vmem:[%s1496_s2 + $0x68] sm:$0xff]  ;;  %s1504_s22 = smov (!%p1204_p4, %s246_s22), 71 }
   0xf   : > { %556 = vmatprep.subr.bf16.mxu0 %v364_v28  ;;  %1035 = vmatprep.subr.bf16.mxu1 %v364_v28  ;;  %v347_v40 = vadd.f32 %v323_v37, %v299_v35  ;;  %v366_v44 = vpack.c.bf16 %v348_v34, %v346_v33  ;;  %v328_v45 = vld [vmem:[%s1496_s2 + $0x78] sm:$0xff]  ;;  %v350_v46 = vadd.f32 %v326_v43, %v302_v41  ;;  %v301_v47 = vld [vmem:[%s1495_s1 + $0x60] sm:$0xff]  ;;  %v303_v48 = vld [vmem:[%s1495_s1 + $0x70] sm:$0xff]  ;;  %s992_s30 = sshll.u32 %s1504_s22, 2  ;;  %s1033_s29 = sshll.u32 %s1504_s22, 4 }
  0x10   : > { %v352_v49 = vadd.f32 %v328_v45, %v304_v42  ;;  %v325_v50 = vld [vmem:[%s1496_s2 + $0x60] sm:$0xff]  ;;  %v327_v51 = vld [vmem:[%s1496_s2 + $0x70] sm:$0xff]  ;;  %v306_v52 = vld [vmem:[%s1495_s1 + $0x88] sm:$0xff]  ;;  %s1314_s26 = scalar_lea.vmem %s1494_s0, %s992_s30  ;;  %s1375_s5 = scalar_lea.vmem %s1497_s3, %s1033_s29 }
  0x11   : > { %557 = vmatpush1.bf16.msra.mxu0 %v363_v38  ;;  %1041 = vmatpush1.bf16.msra.mxu1 %v363_v38  ;;  %v365_v53 = vpack.c.bf16 %v347_v40, %v345_v39  ;;  %v349_v54 = vadd.f32 %v325_v50, %v301_v47  ;;  %v351_v55 = vadd.f32 %v327_v51, %v303_v48  ;;  %v308_v56 = vld [vmem:[%s1495_s1 + $0x98] sm:$0xff]  ;;  %v330_v57 = vld [vmem:[%s1496_s2 + $0x88] sm:$0xff]  ;;  %v305_v62 = vld [vmem:[%s1495_s1 + $0x80] sm:$0xff] }
  0x12   : > { %v332_v58 = vld [vmem:[%s1496_s2 + $0x98] sm:$0xff]  ;;  %558 = vmatprep.subr.bf16.mxu0 %v366_v44  ;;  %1036 = vmatprep.subr.bf16.mxu1 %v366_v44  ;;  %v368_v59 = vpack.c.bf16 %v352_v49, %v350_v46  ;;  %v354_v60 = vadd.f32 %v330_v57, %v306_v52  ;;  %v307_v63 = vld [vmem:[%s1495_s1 + $0x90] sm:$0xff]  ;;  %v329_v0 = vld [vmem:[%s1496_s2 + $0x80] sm:$0xff] }
  0x13   : > { %v356_v61 = vadd.f32 %v332_v58, %v308_v56  ;;  %v331_v1 = vld [vmem:[%s1496_s2 + $0x90] sm:$0xff]  ;;  %v310_v2 = vld [vmem:[%s1495_s1 + $0xa8] sm:$0xff]  ;;  %v312_v3 = vld [vmem:[%s1495_s1 + $0xb8] sm:$0xff]  ;;  %v367_v6 = vpack.c.bf16 %v351_v55, %v349_v54  ;;  %v353_v8 = vadd.f32 %v329_v0, %v305_v62 }
  0x14   : > { %v334_v4 = vld [vmem:[%s1496_s2 + $0xa8] sm:$0xff]  ;;  %v336_v5 = vld [vmem:[%s1496_s2 + $0xb8] sm:$0xff]  ;;  %v355_v9 = vadd.f32 %v331_v1, %v307_v63  ;;  %v309_v10 = vld [vmem:[%s1495_s1 + $0xa0] sm:$0xff] }
  0x15   : > { %559 = vmatpush1.bf16.msra.mxu0 %v365_v53  ;;  %1042 = vmatpush1.bf16.msra.mxu1 %v365_v53  ;;  %v311_v11 = vld [vmem:[%s1495_s1 + $0xb0] sm:$0xff]  ;;  %v333_v12 = vld [vmem:[%s1496_s2 + $0xa0] sm:$0xff]  ;;  %v370_v13 = vpack.c.bf16 %v356_v61, %v354_v60  ;;  %v358_v14 = vadd.f32 %v334_v4, %v310_v2  ;;  %v360_v15 = vadd.f32 %v336_v5, %v312_v3  ;;  %v1072_v23 = vld [vmem:[%s1314_s26 + $0x48] sm:$0xff]  }
  0x16   : > { %560 = vmatprep.subr.bf16.mxu0 %v368_v59  ;;  %1037 = vmatprep.subr.bf16.mxu1 %v368_v59  ;;  %v335_v16 = vld [vmem:[%s1496_s2 + $0xb0] sm:$0xff]  ;;  %v369_v17 = vpack.c.bf16 %v355_v9, %v353_v8  ;;  %v357_v18 = vadd.f32 %v333_v12, %v309_v10  ;;  %v1071_v22 = vld [vmem:[%s1314_s26] sm:$0xff]   ;;  %v1073_v24 = vld [vmem:[%s1314_s26 + $0x8] sm:$0xff]  }
  0x17   : > { %v359_v19 = vadd.f32 %v335_v16, %v311_v11  ;;  %v372_v20 = vpack.c.bf16 %v360_v15, %v358_v14  ;;  %v1074_v25 = vld [vmem:[%s1314_s26 + $0x50] sm:$0xff]   ;;  %v1076_v27 = vld [vmem:[%s1314_s26 + $0x58] sm:$0xff]   ;;  %v1078_v29 = vld [vmem:[%s1314_s26 + $0x60] sm:$0xff]  }
  0x18   : > { %v1075_v26 = vld [vmem:[%s1314_s26 + $0x10] sm:$0xff]   ;;  %v1077_v28 = vld [vmem:[%s1314_s26 + $0x18] sm:$0xff]   ;;  %v1079_v30 = vld [vmem:[%s1314_s26 + $0x20] sm:$0xff]  }
  0x19   : > { %561 = vmatpush1.bf16.msra.mxu0 %v367_v6  ;;  %1043 = vmatpush1.bf16.msra.mxu1 %v367_v6  ;;  %v371_v21 = vpack.c.bf16 %v359_v19, %v357_v18  ;;  %v1080_v31 = vld [vmem:[%s1314_s26 + $0x68] sm:$0xff]   ;;  %v1082_v33 = vld [vmem:[%s1314_s26 + $0x70] sm:$0xff]   ;;  %v1084_v35 = vld [vmem:[%s1314_s26 + $0x78] sm:$0xff]  }
  0x1a   : > { %562 = vmatprep.subr.bf16.mxu0 %v370_v13  ;;  %1038 = vmatprep.subr.bf16.mxu1 %v370_v13  ;;  %v1081_v32 = vld [vmem:[%s1314_s26 + $0x28] sm:$0xff]   ;;  %v1083_v34 = vld [vmem:[%s1314_s26 + $0x30] sm:$0xff]   ;;  %v1085_v36 = vld [vmem:[%s1314_s26 + $0x38] sm:$0xff]  }
  0x1b   : > { %v1086_v37 = vld [vmem:[%s1314_s26 + $0x80] sm:$0xff]   ;;  %v1088_v39 = vld [vmem:[%s1314_s26 + $0x88] sm:$0xff]  }
  0x1c   : > { %v1087_v38 = vld [vmem:[%s1314_s26 + $0x40] sm:$0xff]  }
  0x1d   : > { %563 = vmatpush1.bf16.msra.mxu0 %v369_v17  ;;  %1044 = vmatpush1.bf16.msra.mxu1 %v369_v17 }
  0x1e   : > { %564 = vmatprep.subr.bf16.mxu0 %v372_v20  ;;  %1039 = vmatprep.subr.bf16.mxu1 %v372_v20 }
  0x21   : > { %565 = vmatpush1.bf16.msra.mxu0 %v371_v21  ;;  %1045 = vmatpush1.bf16.msra.mxu1 %v371_v21 }
  0x24   : > { %1013 = vmatmul.mubr.msk.bf16.vlgmr.msra.gmra.mrb[0].mxu0 %vm499_vm0, %v1071_v22  ;;  %1022 = vmatmul.mubr.msk.bf16.vlgmr.msra.gmra.mrb[0].mxu1 %vm499_vm0, %v1072_v23 }
  0x25   : > { %596 = vmatprep.mubr.bf16.mxu0 %v1113_v7  ;;  %686 = vmatprep.mubr.bf16.mxu1 %v1113_v7 }
  0x2c   : > { %1014 = vmatmul.mubr.msk.bf16.gmra.mrb[4].mxu0 %vm499_vm0, %v1073_v24  ;;  %1023 = vmatmul.mubr.msk.bf16.gmra.mrb[4].mxu1 %vm499_vm0, %v1074_v25 }
  0x2d   : > { %606 = vmatprep.mubr.bf16.mxu0 %v1113_v7  ;;  %696 = vmatprep.mubr.bf16.mxu1 %v1113_v7 }
  0x34   : > { %1015 = vmatmul.mubr.msk.bf16.gmra.mrb[8].mxu0 %vm499_vm0, %v1075_v26  ;;  %1024 = vmatmul.mubr.msk.bf16.gmra.mrb[8].mxu1 %vm499_vm0, %v1076_v27 }
  0x35   : > { %616 = vmatprep.mubr.bf16.mxu0 %v1113_v7  ;;  %706 = vmatprep.mubr.bf16.mxu1 %v1113_v7 }
  0x3c   : > { %1016 = vmatmul.mubr.msk.bf16.gmra.mrb[12].mxu0 %vm499_vm0, %v1077_v28  ;;  %1025 = vmatmul.mubr.msk.bf16.gmra.mrb[12].mxu1 %vm499_vm0, %v1078_v29 }
  0x3d   : > { %626 = vmatprep.mubr.bf16.mxu0 %v1113_v7  ;;  %716 = vmatprep.mubr.bf16.mxu1 %v1113_v7 }
  0x44   : > { %1017 = vmatmul.mubr.msk.bf16.gmra.mrb[16].mxu0 %vm499_vm0, %v1079_v30  ;;  %1026 = vmatmul.mubr.msk.bf16.gmra.mrb[16].mxu1 %vm499_vm0, %v1080_v31 }
  0x45   : > { %636 = vmatprep.mubr.bf16.mxu0 %v1113_v7  ;;  %726 = vmatprep.mubr.bf16.mxu1 %v1113_v7 }
  0x4c   : > { %1018 = vmatmul.mubr.msk.bf16.gmra.mrb[20].mxu0 %vm499_vm0, %v1081_v32  ;;  %1027 = vmatmul.mubr.msk.bf16.gmra.mrb[20].mxu1 %vm499_vm0, %v1082_v33 }
  0x4d   : > { %646 = vmatprep.mubr.bf16.mxu0 %v1113_v7  ;;  %736 = vmatprep.mubr.bf16.mxu1 %v1113_v7 }
  0x54   : > { %1019 = vmatmul.mubr.msk.bf16.gmra.mrb[24].mxu0 %vm499_vm0, %v1083_v34  ;;  %1028 = vmatmul.mubr.msk.bf16.gmra.mrb[24].mxu1 %vm499_vm0, %v1084_v35 }
  0x55   : > { %656 = vmatprep.mubr.bf16.mxu0 %v1113_v7  ;;  %746 = vmatprep.mubr.bf16.mxu1 %v1113_v7 }
  0x5c   : > { %1020 = vmatmul.mubr.msk.bf16.gmra.mrb[28].mxu0 %vm499_vm0, %v1085_v36  ;;  %1029 = vmatmul.mubr.msk.bf16.gmra.mrb[28].mxu1 %vm499_vm0, %v1086_v37 }
  0x5d   : > { %666 = vmatprep.mubr.bf16.mxu0 %v1113_v7  ;;  %756 = vmatprep.mubr.bf16.mxu1 %v1113_v7 }
  0x64   : > { %1021 = vmatmul.mubr.msk.bf16.gmra.mrb[32].mxu0 %vm499_vm0, %v1087_v38  ;;  %1030 = vmatmul.mubr.msk.bf16.gmra.mrb[32].mxu1 %vm499_vm0, %v1088_v39 }
  0xf7   : > { %v588_v7 = vpop.f32.mrb[0].mxu0  ;;  %v678_v40 = vpop.f32.mrb[0].mxu1 }
  0xf8   : > { %767 = vst [vmem:[%s1375_s5] sm:$0xff] %v588_v7  ;;  %804 = vst [vmem:[%s1375_s5 + $0x120] sm:$0xff] %v678_v40  ;;  %v590_v41 = vpop.f32.mrb[1].mxu0  ;;  %v680_v42 = vpop.f32.mrb[1].mxu1 }
  0xf9   : > { %769 = vst.msk [vmem:[%s1375_s5 + $0x8] sm:$0xff] %vm768_vm1, %v590_v41  ;;  %805 = vst.msk [vmem:[%s1375_s5 + $0x128] sm:$0xff] %vm768_vm1, %v680_v42  ;;  %v592_v43 = vpop.f32.mrb[2].mxu0  ;;  %v682_v44 = vpop.f32.mrb[2].mxu1 }
  0xfa   : > { %770 = vst [vmem:[%s1375_s5 + $0x10] sm:$0xff] %v592_v43  ;;  %806 = vst [vmem:[%s1375_s5 + $0x130] sm:$0xff] %v682_v44  ;;  %v594_v45 = vpop.f32.mrb[3].mxu0  ;;  %v684_v46 = vpop.f32.mrb[3].mxu1 }
  0xfb   : > { %771 = vst.msk [vmem:[%s1375_s5 + $0x18] sm:$0xff] %vm768_vm1, %v594_v45  ;;  %807 = vst.msk [vmem:[%s1375_s5 + $0x138] sm:$0xff] %vm768_vm1, %v684_v46 }
  0xff   : > { %v598_v47 = vpop.f32.mrb[4].mxu0  ;;  %v688_v48 = vpop.f32.mrb[4].mxu1 }
 0x100   : > { %772 = vst [vmem:[%s1375_s5 + $0x20] sm:$0xff] %v598_v47  ;;  %808 = vst [vmem:[%s1375_s5 + $0x140] sm:$0xff] %v688_v48  ;;  %v600_v49 = vpop.f32.mrb[5].mxu0  ;;  %v690_v50 = vpop.f32.mrb[5].mxu1 }
 0x101   : > { %773 = vst.msk [vmem:[%s1375_s5 + $0x28] sm:$0xff] %vm768_vm1, %v600_v49  ;;  %809 = vst.msk [vmem:[%s1375_s5 + $0x148] sm:$0xff] %vm768_vm1, %v690_v50  ;;  %v602_v51 = vpop.f32.mrb[6].mxu0  ;;  %v692_v52 = vpop.f32.mrb[6].mxu1 }
 0x102   : > { %774 = vst [vmem:[%s1375_s5 + $0x30] sm:$0xff] %v602_v51  ;;  %810 = vst [vmem:[%s1375_s5 + $0x150] sm:$0xff] %v692_v52  ;;  %v604_v53 = vpop.f32.mrb[7].mxu0  ;;  %v694_v54 = vpop.f32.mrb[7].mxu1 }
 0x103   : > { %775 = vst.msk [vmem:[%s1375_s5 + $0x38] sm:$0xff] %vm768_vm1, %v604_v53  ;;  %811 = vst.msk [vmem:[%s1375_s5 + $0x158] sm:$0xff] %vm768_vm1, %v694_v54 }
 0x107   : > { %v608_v55 = vpop.f32.mrb[8].mxu0  ;;  %v698_v56 = vpop.f32.mrb[8].mxu1 }
 0x108   : > { %776 = vst [vmem:[%s1375_s5 + $0x40] sm:$0xff] %v608_v55  ;;  %812 = vst [vmem:[%s1375_s5 + $0x160] sm:$0xff] %v698_v56  ;;  %v610_v57 = vpop.f32.mrb[9].mxu0  ;;  %v700_v58 = vpop.f32.mrb[9].mxu1 }
 0x109   : > { %777 = vst.msk [vmem:[%s1375_s5 + $0x48] sm:$0xff] %vm768_vm1, %v610_v57  ;;  %813 = vst.msk [vmem:[%s1375_s5 + $0x168] sm:$0xff] %vm768_vm1, %v700_v58  ;;  %v612_v59 = vpop.f32.mrb[10].mxu0  ;;  %v702_v60 = vpop.f32.mrb[10].mxu1 }
 0x10a   : > { %778 = vst [vmem:[%s1375_s5 + $0x50] sm:$0xff] %v612_v59  ;;  %814 = vst [vmem:[%s1375_s5 + $0x170] sm:$0xff] %v702_v60  ;;  %v614_v61 = vpop.f32.mrb[11].mxu0  ;;  %v704_v62 = vpop.f32.mrb[11].mxu1 }
 0x10b   : > { %779 = vst.msk [vmem:[%s1375_s5 + $0x58] sm:$0xff] %vm768_vm1, %v614_v61  ;;  %815 = vst.msk [vmem:[%s1375_s5 + $0x178] sm:$0xff] %vm768_vm1, %v704_v62 }
 0x10f   : > { %v618_v63 = vpop.f32.mrb[12].mxu0  ;;  %v708_v0 = vpop.f32.mrb[12].mxu1 }
 0x110   : > { %780 = vst [vmem:[%s1375_s5 + $0x60] sm:$0xff] %v618_v63  ;;  %816 = vst [vmem:[%s1375_s5 + $0x180] sm:$0xff] %v708_v0  ;;  %v620_v1 = vpop.f32.mrb[13].mxu0  ;;  %v710_v2 = vpop.f32.mrb[13].mxu1 }
 0x111   : > { %781 = vst.msk [vmem:[%s1375_s5 + $0x68] sm:$0xff] %vm768_vm1, %v620_v1  ;;  %817 = vst.msk [vmem:[%s1375_s5 + $0x188] sm:$0xff] %vm768_vm1, %v710_v2  ;;  %v622_v3 = vpop.f32.mrb[14].mxu0  ;;  %v712_v4 = vpop.f32.mrb[14].mxu1 }
 0x112   : > { %782 = vst [vmem:[%s1375_s5 + $0x70] sm:$0xff] %v622_v3  ;;  %818 = vst [vmem:[%s1375_s5 + $0x190] sm:$0xff] %v712_v4  ;;  %v624_v5 = vpop.f32.mrb[15].mxu0  ;;  %v714_v6 = vpop.f32.mrb[15].mxu1 }
 0x113   : > { %783 = vst.msk [vmem:[%s1375_s5 + $0x78] sm:$0xff] %vm768_vm1, %v624_v5  ;;  %819 = vst.msk [vmem:[%s1375_s5 + $0x198] sm:$0xff] %vm768_vm1, %v714_v6 }
 0x117   : > { %v628_v8 = vpop.f32.mrb[16].mxu0  ;;  %v718_v9 = vpop.f32.mrb[16].mxu1 }
 0x118   : > { %784 = vst [vmem:[%s1375_s5 + $0x80] sm:$0xff] %v628_v8  ;;  %820 = vst [vmem:[%s1375_s5 + $0x1a0] sm:$0xff] %v718_v9  ;;  %v630_v10 = vpop.f32.mrb[17].mxu0  ;;  %v720_v11 = vpop.f32.mrb[17].mxu1 }
 0x119   : > { %785 = vst.msk [vmem:[%s1375_s5 + $0x88] sm:$0xff] %vm768_vm1, %v630_v10  ;;  %821 = vst.msk [vmem:[%s1375_s5 + $0x1a8] sm:$0xff] %vm768_vm1, %v720_v11  ;;  %v632_v12 = vpop.f32.mrb[18].mxu0  ;;  %v722_v13 = vpop.f32.mrb[18].mxu1 }
 0x11a   : > { %786 = vst [vmem:[%s1375_s5 + $0x90] sm:$0xff] %v632_v12  ;;  %822 = vst [vmem:[%s1375_s5 + $0x1b0] sm:$0xff] %v722_v13  ;;  %v634_v14 = vpop.f32.mrb[19].mxu0  ;;  %v724_v15 = vpop.f32.mrb[19].mxu1 }
 0x11b   : > { %787 = vst.msk [vmem:[%s1375_s5 + $0x98] sm:$0xff] %vm768_vm1, %v634_v14  ;;  %823 = vst.msk [vmem:[%s1375_s5 + $0x1b8] sm:$0xff] %vm768_vm1, %v724_v15 }
 0x11f   : > { %v638_v16 = vpop.f32.mrb[20].mxu0  ;;  %v728_v17 = vpop.f32.mrb[20].mxu1 }
 0x120   : > { %788 = vst [vmem:[%s1375_s5 + $0xa0] sm:$0xff] %v638_v16  ;;  %824 = vst [vmem:[%s1375_s5 + $0x1c0] sm:$0xff] %v728_v17  ;;  %v640_v18 = vpop.f32.mrb[21].mxu0  ;;  %v730_v19 = vpop.f32.mrb[21].mxu1 }
 0x121   : > { %789 = vst.msk [vmem:[%s1375_s5 + $0xa8] sm:$0xff] %vm768_vm1, %v640_v18  ;;  %825 = vst.msk [vmem:[%s1375_s5 + $0x1c8] sm:$0xff] %vm768_vm1, %v730_v19  ;;  %v642_v20 = vpop.f32.mrb[22].mxu0  ;;  %v732_v21 = vpop.f32.mrb[22].mxu1 }
 0x122   : > { %790 = vst [vmem:[%s1375_s5 + $0xb0] sm:$0xff] %v642_v20  ;;  %826 = vst [vmem:[%s1375_s5 + $0x1d0] sm:$0xff] %v732_v21  ;;  %v644_v22 = vpop.f32.mrb[23].mxu0  ;;  %v734_v23 = vpop.f32.mrb[23].mxu1 }
 0x123   : > { %791 = vst.msk [vmem:[%s1375_s5 + $0xb8] sm:$0xff] %vm768_vm1, %v644_v22  ;;  %827 = vst.msk [vmem:[%s1375_s5 + $0x1d8] sm:$0xff] %vm768_vm1, %v734_v23 }
 0x127   : > { %v648_v24 = vpop.f32.mrb[24].mxu0  ;;  %v738_v25 = vpop.f32.mrb[24].mxu1 }
 0x128   : > { %792 = vst [vmem:[%s1375_s5 + $0xc0] sm:$0xff] %v648_v24  ;;  %828 = vst [vmem:[%s1375_s5 + $0x1e0] sm:$0xff] %v738_v25  ;;  %v650_v26 = vpop.f32.mrb[25].mxu0  ;;  %v740_v27 = vpop.f32.mrb[25].mxu1 }
 0x129   : > { %793 = vst.msk [vmem:[%s1375_s5 + $0xc8] sm:$0xff] %vm768_vm1, %v650_v26  ;;  %829 = vst.msk [vmem:[%s1375_s5 + $0x1e8] sm:$0xff] %vm768_vm1, %v740_v27  ;;  %v652_v28 = vpop.f32.mrb[26].mxu0  ;;  %v742_v29 = vpop.f32.mrb[26].mxu1 }
 0x12a   : > { %794 = vst [vmem:[%s1375_s5 + $0xd0] sm:$0xff] %v652_v28  ;;  %830 = vst [vmem:[%s1375_s5 + $0x1f0] sm:$0xff] %v742_v29  ;;  %v654_v30 = vpop.f32.mrb[27].mxu0  ;;  %v744_v31 = vpop.f32.mrb[27].mxu1 }
 0x12b   : > { %795 = vst.msk [vmem:[%s1375_s5 + $0xd8] sm:$0xff] %vm768_vm1, %v654_v30  ;;  %831 = vst.msk [vmem:[%s1375_s5 + $0x1f8] sm:$0xff] %vm768_vm1, %v744_v31 }
 0x12f   : > { %v658_v32 = vpop.f32.mrb[28].mxu0  ;;  %v748_v33 = vpop.f32.mrb[28].mxu1 }
 0x130   : > { %796 = vst [vmem:[%s1375_s5 + $0xe0] sm:$0xff] %v658_v32  ;;  %832 = vst [vmem:[%s1375_s5 + $0x200] sm:$0xff] %v748_v33  ;;  %v660_v34 = vpop.f32.mrb[29].mxu0  ;;  %v750_v35 = vpop.f32.mrb[29].mxu1 }
 0x131   : > { %797 = vst.msk [vmem:[%s1375_s5 + $0xe8] sm:$0xff] %vm768_vm1, %v660_v34  ;;  %833 = vst.msk [vmem:[%s1375_s5 + $0x208] sm:$0xff] %vm768_vm1, %v750_v35  ;;  %v662_v36 = vpop.f32.mrb[30].mxu0  ;;  %v752_v37 = vpop.f32.mrb[30].mxu1 }
 0x132   : > { %798 = vst [vmem:[%s1375_s5 + $0xf0] sm:$0xff] %v662_v36  ;;  %834 = vst [vmem:[%s1375_s5 + $0x210] sm:$0xff] %v752_v37  ;;  %v664_v38 = vpop.f32.mrb[31].mxu0  ;;  %v754_v39 = vpop.f32.mrb[31].mxu1 }
 0x133   : > { %799 = vst.msk [vmem:[%s1375_s5 + $0xf8] sm:$0xff] %vm768_vm1, %v664_v38  ;;  %835 = vst.msk [vmem:[%s1375_s5 + $0x218] sm:$0xff] %vm768_vm1, %v754_v39 }
 0x137   : > { %v668_v7 = vpop.f32.mrb[32].mxu0  ;;  %v758_v40 = vpop.f32.mrb[32].mxu1 }
 0x138   : > { %800 = vst [vmem:[%s1375_s5 + $0x100] sm:$0xff] %v668_v7  ;;  %836 = vst [vmem:[%s1375_s5 + $0x220] sm:$0xff] %v758_v40  ;;  %v670_v41 = vpop.f32.mrb[33].mxu0  ;;  %v760_v42 = vpop.f32.mrb[33].mxu1 }
 0x139   : > { %801 = vst.msk [vmem:[%s1375_s5 + $0x108] sm:$0xff] %vm768_vm1, %v670_v41  ;;  %837 = vst.msk [vmem:[%s1375_s5 + $0x228] sm:$0xff] %vm768_vm1, %v760_v42  ;;  %v672_v43 = vpop.f32.mrb[34].mxu0  ;;  %v762_v44 = vpop.f32.mrb[34].mxu1 }
 0x13a   : > { %802 = vst [vmem:[%s1375_s5 + $0x110] sm:$0xff] %v672_v43  ;;  %838 = vst [vmem:[%s1375_s5 + $0x230] sm:$0xff] %v762_v44  ;;  %v674_v45 = vpop.f32.mrb[35].mxu0  ;;  %v764_v46 = vpop.f32.mrb[35].mxu1 }
 0x13b   : > { %803 = vst.msk [vmem:[%s1375_s5 + $0x118] sm:$0xff] %vm768_vm1, %v674_v45  ;;  %839 = vst.msk [vmem:[%s1375_s5 + $0x238] sm:$0xff] %vm768_vm1, %v764_v46 }
 0x13c PF: > { %s13_s14 = sadd.s32 1, %s1111_s14   ;;  %s1499_s12 = smov %s1107_s13 }
 0x13d   : > { %p10_p5 = scmp.ge.s32.totalorder %s13_s14, 4   ;;  %s1500_s13 = smov %s1502_s15 }
 0x13f   :  { %12 = sbr.rel (!%p10_p5) target bundleno = 2 (0x2), region = 68 }

</bundles_post_ra>
